<compile_context>
chip_gen: v5e
topology: v5e:2x2
jax: 0.10.0
libtpu: 0.0.40
codegen_flags: <defaults>
</compile_context>

<pallas_src>
import jax
import jax.numpy as jnp
from jax import lax
from jax.experimental import pallas as pl
from jax.experimental.pallas import tpu as pltpu


def two_layer_kernel(x_ref, w1_ref, w2_ref, o_ref):
    # layer1: h = x @ W1^T  (PyTorch nn.Linear weight layout is (out, in),
    # so contract last dim of x with last dim of W1 -> transposed-RHS MXU push).
    h = lax.dot_general(
        x_ref[...],
        w1_ref[...],
        dimension_numbers=(((1,), (1,)), ((), ())),
        preferred_element_type=jnp.float32,
    )
    # layer2: y = h @ W2^T (same contraction pattern, stays on the MXU).
    y = lax.dot_general(
        h,
        w2_ref[...],
        dimension_numbers=(((1,), (1,)), ((), ())),
        preferred_element_type=jnp.float32,
    )
    o_ref[...] = y.astype(o_ref.dtype)


@jax.jit
def two_layer_forward(x, w1, w2):
    """layer2(layer1(x)) = (x @ W1^T) @ W2^T for bias-free linears, one kernel."""
    B, F = x.shape
    return pl.pallas_call(
        two_layer_kernel,
        out_shape=jax.ShapeDtypeStruct((B, F), x.dtype),
        in_specs=[
            pl.BlockSpec(memory_space=pltpu.MemorySpace.VMEM),  # x  (B, F)
            pl.BlockSpec(memory_space=pltpu.MemorySpace.VMEM),  # w1 (F, F)
            pl.BlockSpec(memory_space=pltpu.MemorySpace.VMEM),  # w2 (F, F)
        ],
        out_specs=pl.BlockSpec(memory_space=pltpu.MemorySpace.VMEM),
    )(x, w1, w2)


if __name__ == "__main__":
    key = jax.random.PRNGKey(0)
    kx, k1, k2 = jax.random.split(key, 3)

    B, F = 8, 10  # nn.Linear(10, 10) => feature dim 10
    x = jax.random.normal(kx, (B, F), dtype=jnp.float32)
    # Deterministic Kaiming-uniform-like init: uniform in [-1/sqrt(10), 1/sqrt(10)]
    bound = 1.0 / jnp.sqrt(jnp.float32(F))
    w1 = jax.random.uniform(k1, (F, F), dtype=jnp.float32, minval=-bound, maxval=bound)
    w2 = jax.random.uniform(k2, (F, F), dtype=jnp.float32, minval=-bound, maxval=bound)

    out = two_layer_forward(x, w1, w2)
    out = jax.block_until_ready(out)

    # Reference: the original PyTorch forward, bias-free, no activation.
    ref = (x @ w1.T) @ w2.T
    assert out.shape == (B, F)
    assert jnp.allclose(out, ref, atol=1e-5, rtol=1e-5)

    print("KERNEL_OK")
</pallas_src>

<mosaic_0001>
module attributes {stable_mosaic.version = 11 : i64} {
  func.func @two_layer_kernel(%arg0: memref<8x10xf32, #tpu.memory_space<vmem>>, %arg1: memref<10x10xf32, #tpu.memory_space<vmem>>, %arg2: memref<10x10xf32, #tpu.memory_space<vmem>>, %arg3: memref<8x10xf32, #tpu.memory_space<vmem>>) attributes {dimension_semantics = [], scalar_prefetch = 0 : i64, scratch_operands = 0 : i64, tpu.core_type = #tpu.core_type<tc>} {
    %c0 = arith.constant 0 : index
    %c0_0 = arith.constant 0 : index
    %0 = vector.load %arg0[%c0, %c0_0] : memref<8x10xf32, #tpu.memory_space<vmem>>, vector<8x10xf32>
    %c0_1 = arith.constant 0 : index
    %c0_2 = arith.constant 0 : index
    %1 = vector.load %arg1[%c0_1, %c0_2] : memref<10x10xf32, #tpu.memory_space<vmem>>, vector<10x10xf32>
    %cst = arith.constant dense<0.000000e+00> : vector<8x10xf32>
    %2 = tpu.matmul %0, %1, %cst {dimension_numbers = #tpu.dot_dimension_numbers<[1], [1], [0], [0], [0, 0, 1, 0], [], []>} : vector<8x10xf32>, vector<10x10xf32>, vector<8x10xf32> -> vector<8x10xf32>
    %c0_3 = arith.constant 0 : index
    %c0_4 = arith.constant 0 : index
    %3 = vector.load %arg2[%c0_3, %c0_4] : memref<10x10xf32, #tpu.memory_space<vmem>>, vector<10x10xf32>
    %cst_5 = arith.constant dense<0.000000e+00> : vector<8x10xf32>
    %4 = tpu.matmul %2, %3, %cst_5 {dimension_numbers = #tpu.dot_dimension_numbers<[1], [1], [0], [0], [0, 0, 1, 0], [], []>} : vector<8x10xf32>, vector<10x10xf32>, vector<8x10xf32> -> vector<8x10xf32>
    %c0_6 = arith.constant 0 : index
    %c0_7 = arith.constant 0 : index
    %5 = vector.load %arg3[%c0_6, %c0_7] : memref<8x10xf32, #tpu.memory_space<vmem>>, vector<8x10xf32>
    tpu.vector_store %arg3[%c0_6, %c0_7], %4 {strides = array<i32>} : memref<8x10xf32, #tpu.memory_space<vmem>>, vector<8x10xf32>,
    return
  }
}

</mosaic_0001>

<bundles_post_ra>
// kernel: two_layer_forward.1
= control target key start
LH: loop header
LB: loop body
LE: loop exit
PB: predicated region body
PF: predicated region fallthrough
CT: control target
= control target key end

     0   :  { %8 = vsyncpa [#allocation3], 0  ;;  %s302_s0 = inlined_call_operand.hbm [shape: f32[8,10], index: 0, kind: input, shape index: {}]   ;;  %s303_s1 = inlined_call_operand.hbm [shape: f32[10,10], index: 1, kind: input, shape index: {}]   ;;  %s304_s2 = inlined_call_operand.hbm [shape: f32[10,10], index: 2, kind: input, shape index: {}]   ;;  %s305_s3 = inlined_call_operand.hbm [shape: f32[8,10], index: 3, kind: output, shape index: {}]  }
   0x1   :  { %9 = vsyncpa [#allocation6], 0  ;;  %s26_s14 = sshll.u32 %s303_s1, 4  ;;  %s27_s14 = int_to_ptr.hbm [resolvable:$true] %s26_s14 }
   0x2   :  { %10 = vsyncpa [#allocation4], 0  ;;  %s257_s15 = smov [#allocation5]   ;;  %s16_s19 = sshll.u32 %s302_s0, 4  ;;  %s17_s19 = int_to_ptr.hbm [resolvable:$true] %s16_s19 }
   0x3   :  { %s28_s16 = sshll.u32 %s257_s15, 4  ;;  %s258_s20 = smov 128   ;;  %s29_s16 = int_to_ptr.vmem [resolvable:$true] %s28_s16 }
   0x4   :  { %s259_s21 = smov 8   ;;  %s260_s22 = smov [#allocation2]  }
   0x5   :  { %34 = dma.hbm_to_vmem [thread:$0]  %s27_s14, 256, %s29_s16, [#allocation6], %s258_s20, %s258_s20, %s259_s21  }
   0x6   :  { %s18_s23 = sshll.u32 %s260_s22, 4  ;;  %s39_s26 = sshll.u32 %s304_s2, 4  ;;  %s19_s23 = int_to_ptr.vmem [resolvable:$true] %s18_s23  ;;  %s40_s26 = int_to_ptr.hbm [resolvable:$true] %s39_s26 }
   0x7   :  { %21 = dma.hbm_to_vmem [thread:$0]  %s17_s19, 128, %s19_s23, [#allocation3]  }
   0x8   :  { %s261_s1 = smov [#allocation7]  }
   0x9   :  { %s41_s27 = sshll.u32 %s261_s1, 4  ;;  %s42_s27 = int_to_ptr.vmem [resolvable:$true] %s41_s27 }
   0xa   :  { %47 = dma.hbm_to_vmem [thread:$0]  %s40_s26, 256, %s42_s27, [#allocation6], %s258_s20, %s258_s20, %s259_s21  }
   0xb   :  { %251 = dma.done.wait [#allocation3], 128  }
   0xc   :  { %252 = vsyncadd [#allocation3], 4294967168 }
   0xd   :  { %253 = dma.done.wait [#allocation6], 512  }
   0xe   :  { %254 = vsyncadd [#allocation6], 4294966784  ;;  %vm63_vm0 = vcmask 80896   ;;  %v62_v0 = vld [vmem:[#allocation5 + $0x8] sm:$0x3]  ;;  %v61_v2 = vld [vmem:[#allocation5] sm:$0xff] }
   0xf   :  { %143 = vmatpush.xpose.msk.msra.mxu0 %vm63_vm0, %v62_v0  ;;  %v94_v1 = vld [vmem:[#allocation7 + $0x8] sm:$0x3]  ;;  %v93_v3 = vld [vmem:[#allocation7] sm:$0xff]  ;;  %s262_s0 = smov [#allocation8]   ;;  %s132_s30 = sshll.u32 %s305_s3, 4  ;;  %s133_s30 = int_to_ptr.hbm [resolvable:$true] %s132_s30 }
  0x10   :  { %146 = vmatpush.xpose.msk.msra.mxu1 %vm63_vm0, %v94_v1  ;;  %v60_v4 = vld [vmem:[#allocation2] sm:$0xff]  ;;  %s130_s2 = sshll.u32 %s262_s0, 4  ;;  %s131_s2 = int_to_ptr.vmem [resolvable:$true] %s130_s2 }
  0x13   :  { %144 = vmatpush.xpose.msk.msra.mxu0 %vm63_vm0, %v61_v2 }
  0x14   :  { %147 = vmatpush.xpose.msk.msra.mxu1 %vm63_vm0, %v93_v3 }
  0x16   :  { %145 = vmatmul.msk.f32.vlgmr.msra.gmra.mxu0 %vm63_vm0, %v60_v4 }
  0x93   :  { %v90_v5 = vpop.f32.mrf.mxu0 }
  0x94   :  { %148 = vmatmul.msk.f32.vlgmr.msra.gmra.mxu1 %vm63_vm0, %v90_v5 }
 0x111   :  { %v121_v6 = vpop.f32.mrf.mxu1 }
 0x112   :  { %124 = vst.msk [vmem:[#allocation8] sm:$0xff] %vm63_vm0, %v121_v6 }
 0x113   :  { %135 = dma.vmem_to_hbm [thread:$0]  %s131_s2, 128, %s133_s30, [#allocation4]  }
 0x114   :  { %255 = dma.done.wait [#allocation4], 128  }
 0x115   :  { %256 = vsyncadd [#allocation4], 4294967168 }
 0x116   :  { %140 = vsyncpa [#allocation3], 1 }
 0x117   :  { %141 = vsyncpa [#allocation6], 1 }
 0x118   :  { %142 = vsyncpa [#allocation4], 1 }

</bundles_post_ra>
